<compile_context>
chip_gen: v6e
topology: v6e:2x2x1
jax: 0.10.0
libtpu: 0.0.40
codegen_flags: <defaults>
</compile_context>

<pallas_src>
import functools

import jax
import jax.numpy as jnp
from jax import lax
from jax.experimental import pallas as pl
from jax.experimental.pallas import tpu as pltpu  # noqa: F401  (TPU backend assumed)


# ----------------------------------------------------------------------------
# Single fused kernel: conv (per-sample MXU matmul) + tanh/ELU conditioning +
# BatchNorm2d (training-mode batch stats), single algebraic write pass.
# No grid — the whole (tiny) problem fits VMEM comfortably on v5e/v6e/v7x.
# ----------------------------------------------------------------------------
def _fused_kernel(patches_ref, w_ref, betaT_ref, wso_ref, pc_ref, o_ref, *, N, HW, eps):
    Cout = o_ref.shape[1]

    # Conditioning for ALL samples in ONE MXU matmul (biases folded via ones-row):
    #   (2*Cout, sdim+1) @ (sdim+1, N) -> (2*Cout, N)
    cond = jnp.dot(wso_ref[...], betaT_ref[...], preferred_element_type=jnp.float32)
    s_lin = cond[:Cout, :]                                          # (Cout, N)
    o_lin = cond[Cout:, :]                                          # (Cout, N)
    scale = jnp.tanh(s_lin)
    offset = jnp.where(o_lin > 0.0, o_lin,
                       jnp.exp(jnp.minimum(o_lin, 0.0)) - 1.0)      # ELU(alpha=1)

    # Packed per-channel params: [conv_b, bn_gamma, bn_beta]
    cb = pc_ref[:, 0:1]                                             # (Cout, 1)
    gam = pc_ref[:, 1:2]
    bet = pc_ref[:, 2:3]

    # Absorb the conv bias into the offset:  y = s*(conv0 + cb) + off = s*conv0 + off_eff
    off_eff = scale * cb + offset                                   # (Cout, N)

    # Conv per sample: (Cout, KKC) @ (KKC, HW) -> (Cout, HW); static unroll, N is small.
    convs = []
    csum = []
    csq = []
    for n in range(N):
        c = jnp.dot(w_ref[...], patches_ref[n],
                    preferred_element_type=jnp.float32)             # (Cout, HW)
        convs.append(c)
        csum.append(jnp.sum(c, axis=-1, keepdims=True))             # (Cout, 1)
        csq.append(jnp.sum(c * c, axis=-1, keepdims=True))          # (Cout, 1)

    # BatchNorm2d batch stats (biased) on tiny (Cout,1) tiles — no slab re-reads.
    inv_cnt = 1.0 / float(N * HW)
    mu_acc = jnp.zeros((Cout, 1), jnp.float32)
    for n in range(N):
        s_n = scale[:, n:n + 1]
        mu_acc = mu_acc + s_n * csum[n] + float(HW) * off_eff[:, n:n + 1]
    mean = mu_acc * inv_cnt                                         # (Cout, 1)

    ss = jnp.zeros((Cout, 1), jnp.float32)
    for n in range(N):
        s_n = scale[:, n:n + 1]
        d_n = off_eff[:, n:n + 1] - mean
        # sum_hw (s*conv0 + d)^2 = s^2*csq + 2*s*d*csum + HW*d^2
        ss = ss + s_n * s_n * csq[n] + 2.0 * s_n * d_n * csum[n] + float(HW) * d_n * d_n
    inv = lax.rsqrt(ss * inv_cnt + eps)                             # (Cout, 1)

    # Folded BN affine: out = conv0 * A_n + B_n   (2 VPU ops per element, single write pass)
    a = inv * gam                                                   # (Cout, 1)
    for n in range(N):
        A_n = scale[:, n:n + 1] * a
        B_n = (off_eff[:, n:n + 1] - mean) * a + bet
        o_ref[n] = (convs[n] * A_n + B_n).astype(o_ref.dtype)
    # TODO(synk): BatchNorm running_mean / running_var momentum bookkeeping (training-side
    # state update) is not materialized; only the forward output (batch-stats path) is produced.


# ----------------------------------------------------------------------------
# Wrapper (NCHW in / NCHW out, matching the PyTorch module)
# ----------------------------------------------------------------------------
def cond_conv2d_forward(z_nchw, beta, params, *, kernel=3, eps=1e-5):
    N, Cin, H, W = z_nchw.shape
    Cout = params["conv_w"].shape[0]
    K = kernel
    pad = K // 2
    HW = H * W               # multiple of 128 -> unmasked 256-lane stores (perf only)
    KKC = Cin * K * K

    # im2col glue (plain JAX, one small formatting pass; NO transpose — kernel indexes per n):
    # contraction index ordered (cin, kh, kw) to match conv_w.reshape(Cout, Cin*K*K).
    x_pad = jnp.pad(z_nchw, ((0, 0), (0, 0), (pad, pad), (pad, pad)))
    taps = [x_pad[:, :, kh:kh + H, kw:kw + W] for kh in range(K) for kw in range(K)]
    patches = jnp.stack(taps, axis=2).reshape(N, KKC, HW)           # (N, Cin*K*K, H*W)

    w_flat = params["conv_w"].reshape(Cout, KKC)                    # (Cout, Cin*K*K)

    # Fused conditioning weight with bias column; beta^T augmented with a ones-row.
    w_so = jnp.concatenate([params["scale_w"], params["offset_w"]], axis=0)   # (2*Cout, sdim)
    b_so = jnp.concatenate([params["scale_b"], params["offset_b"]], axis=0)[:, None]
    w_so_aug = jnp.concatenate([w_so, b_so], axis=1)                # (2*Cout, sdim+1)
    betaT_aug = jnp.concatenate(
        [beta.T, jnp.ones((1, N), beta.dtype)], axis=0)             # (sdim+1, N)

    # Packed per-channel vector params: [conv_b, bn_gamma, bn_beta]
    pc = jnp.stack([params["conv_b"], params["bn_gamma"], params["bn_beta"]],
                   axis=1)                                          # (Cout, 3)

    kern = functools.partial(_fused_kernel, N=N, HW=HW, eps=eps)
    out = pl.pallas_call(
        kern,
        out_shape=jax.ShapeDtypeStruct((N, Cout, HW), jnp.float32),
    )(patches, w_flat, betaT_aug, w_so_aug, pc)

    return out.reshape(N, Cout, H, W), beta


# ----------------------------------------------------------------------------
# Pure-JAX reference (same math, used only for verification)
# ----------------------------------------------------------------------------
def reference_forward(z, beta, params, *, eps=1e-5):
    out = lax.conv_general_dilated(
        z, params["conv_w"], window_strides=(1, 1), padding="SAME",
        dimension_numbers=("NCHW", "OIHW", "NCHW"))
    out = out + params["conv_b"][None, :, None, None]
    s = jnp.tanh(beta @ params["scale_w"].T + params["scale_b"])
    o_lin = beta @ params["offset_w"].T + params["offset_b"]
    off = jnp.where(o_lin > 0.0, o_lin, jnp.exp(jnp.minimum(o_lin, 0.0)) - 1.0)
    out = s[:, :, None, None] * out + off[:, :, None, None]
    mean = jnp.mean(out, axis=(0, 2, 3), keepdims=True)
    var = jnp.mean((out - mean) ** 2, axis=(0, 2, 3), keepdims=True)
    out = (out - mean) / jnp.sqrt(var + eps)
    out = (out * params["bn_gamma"][None, :, None, None]
           + params["bn_beta"][None, :, None, None])
    return out, beta


if __name__ == "__main__":
    # small shapes consistent with the module
    N, Cin, Cout, H, W, sdim, K = 2, 4, 8, 16, 16, 8, 3

    key = jax.random.PRNGKey(0)
    k = jax.random.split(key, 8)
    params = {
        "conv_w": 0.1 * jax.random.normal(k[0], (Cout, Cin, K, K), jnp.float32),
        "conv_b": 0.1 * jax.random.normal(k[1], (Cout,), jnp.float32),
        "scale_w": 0.1 * jax.random.normal(k[2], (Cout, sdim), jnp.float32),
        "scale_b": 0.1 * jax.random.normal(k[3], (Cout,), jnp.float32),
        "offset_w": 0.1 * jax.random.normal(k[4], (Cout, sdim), jnp.float32),
        "offset_b": 0.1 * jax.random.normal(k[5], (Cout,), jnp.float32),
        "bn_gamma": jnp.ones((Cout,), jnp.float32),
        "bn_beta": jnp.zeros((Cout,), jnp.float32),
    }

    z = jax.random.normal(k[6], (N, Cin, H, W), jnp.float32)
    beta = jax.random.normal(k[7], (N, sdim), jnp.float32)

    out, beta_out = cond_conv2d_forward(z, beta, params, kernel=K)
    out = jax.block_until_ready(out)
    beta_out = jax.block_until_ready(beta_out)

    ref_out, ref_beta = reference_forward(z, beta, params)
    assert out.shape == (N, Cout, H, W)
    assert jnp.allclose(out, ref_out, rtol=1e-4, atol=1e-4), "mismatch vs reference"
    assert jnp.allclose(beta_out, ref_beta), "beta passthrough mismatch"

    print("KERNEL_OK")
</pallas_src>

<mosaic_0001>
module attributes {stable_mosaic.version = 11 : i64} {
  func.func @_fused_kernel(%arg0: memref<2x36x256xf32, #tpu.memory_space<vmem>>, %arg1: memref<8x36xf32, #tpu.memory_space<vmem>>, %arg2: memref<9x2xf32, #tpu.memory_space<vmem>>, %arg3: memref<16x9xf32, #tpu.memory_space<vmem>>, %arg4: memref<8x3xf32, #tpu.memory_space<vmem>>, %arg5: memref<2x8x256xf32, #tpu.memory_space<vmem>>) attributes {dimension_semantics = [], scalar_prefetch = 0 : i64, scratch_operands = 0 : i64, tpu.core_type = #tpu.core_type<tc>} {
    %c0 = arith.constant 0 : index
    %c0_0 = arith.constant 0 : index
    %0 = vector.load %arg3[%c0, %c0_0] : memref<16x9xf32, #tpu.memory_space<vmem>>, vector<16x9xf32>
    %c0_1 = arith.constant 0 : index
    %c0_2 = arith.constant 0 : index
    %1 = vector.load %arg2[%c0_1, %c0_2] : memref<9x2xf32, #tpu.memory_space<vmem>>, vector<9x2xf32>
    %cst = arith.constant dense<0.000000e+00> : vector<16x2xf32>
    %2 = tpu.matmul %0, %1, %cst {dimension_numbers = #tpu.dot_dimension_numbers<[1], [0], [0], [1], [0, 0, 1, 1], [], []>} : vector<16x9xf32>, vector<9x2xf32>, vector<16x2xf32> -> vector<16x2xf32>
    %3 = vector.extract_strided_slice %2 {offsets = [0, 0], sizes = [8, 2], strides = [1, 1]} : vector<16x2xf32> to vector<8x2xf32>
    %4 = vector.extract_strided_slice %2 {offsets = [8, 0], sizes = [8, 2], strides = [1, 1]} : vector<16x2xf32> to vector<8x2xf32>
    %5 = math.tanh %3 : vector<8x2xf32>
    %cst_3 = arith.constant 0.000000e+00 : f32
    %6 = vector.broadcast %cst_3 : f32 to vector<8x2xf32>
    %7 = arith.cmpf ogt, %4, %6 : vector<8x2xf32>
    %cst_4 = arith.constant 0.000000e+00 : f32
    %8 = vector.broadcast %cst_4 : f32 to vector<8x2xf32>
    %9 = arith.minimumf %4, %8 : vector<8x2xf32>
    %10 = math.exp %9 : vector<8x2xf32>
    %cst_5 = arith.constant 1.000000e+00 : f32
    %11 = vector.broadcast %cst_5 : f32 to vector<8x2xf32>
    %12 = arith.subf %10, %11 : vector<8x2xf32>
    %13 = arith.select %7, %4, %12 : vector<8x2xi1>, vector<8x2xf32>
    %c0_6 = arith.constant 0 : index
    %c0_7 = arith.constant 0 : index
    %14 = vector.load %arg4[%c0_6, %c0_7] : memref<8x3xf32, #tpu.memory_space<vmem>>, vector<8x1xf32>
    %c0_8 = arith.constant 0 : index
    %c1 = arith.constant 1 : index
    %15 = vector.load %arg4[%c0_8, %c1] : memref<8x3xf32, #tpu.memory_space<vmem>>, vector<8x1xf32>
    %c0_9 = arith.constant 0 : index
    %c2 = arith.constant 2 : index
    %16 = vector.load %arg4[%c0_9, %c2] : memref<8x3xf32, #tpu.memory_space<vmem>>, vector<8x1xf32>
    %17 = vector.broadcast %14 : vector<8x1xf32> to vector<8x2xf32>
    %18 = arith.mulf %5, %17 : vector<8x2xf32>
    %19 = arith.addf %18, %13 : vector<8x2xf32>
    %c0_10 = arith.constant 0 : index
    %c0_11 = arith.constant 0 : index
    %20 = vector.load %arg1[%c0_10, %c0_11] : memref<8x36xf32, #tpu.memory_space<vmem>>, vector<8x36xf32>
    %c0_12 = arith.constant 0 : index
    %c0_13 = arith.constant 0 : index
    %c0_14 = arith.constant 0 : index
    %21 = vector.load %arg0[%c0_12, %c0_13, %c0_14] : memref<2x36x256xf32, #tpu.memory_space<vmem>>, vector<1x36x256xf32>
    %22 = vector.shape_cast %21 : vector<1x36x256xf32> to vector<36x256xf32>
    %cst_15 = arith.constant dense<0.000000e+00> : vector<8x256xf32>
    %23 = tpu.matmul %20, %22, %cst_15 {dimension_numbers = #tpu.dot_dimension_numbers<[1], [0], [0], [1], [0, 0, 1, 1], [], []>} : vector<8x36xf32>, vector<36x256xf32>, vector<8x256xf32> -> vector<8x256xf32>
    %cst_16 = arith.constant dense<0.000000e+00> : vector<8xf32>
    %24 = vector.multi_reduction <add>, %23, %cst_16 [1] : vector<8x256xf32> to vector<8xf32>
    %25 = vector.shape_cast %24 : vector<8xf32> to vector<8x1xf32>
    %26 = arith.mulf %23, %23 : vector<8x256xf32>
    %cst_17 = arith.constant dense<0.000000e+00> : vector<8xf32>
    %27 = vector.multi_reduction <add>, %26, %cst_17 [1] : vector<8x256xf32> to vector<8xf32>
    %28 = vector.shape_cast %27 : vector<8xf32> to vector<8x1xf32>
    %c0_18 = arith.constant 0 : index
    %c0_19 = arith.constant 0 : index
    %29 = vector.load %arg1[%c0_18, %c0_19] : memref<8x36xf32, #tpu.memory_space<vmem>>, vector<8x36xf32>
    %c1_20 = arith.constant 1 : index
    %c0_21 = arith.constant 0 : index
    %c0_22 = arith.constant 0 : index
    %30 = vector.load %arg0[%c1_20, %c0_21, %c0_22] : memref<2x36x256xf32, #tpu.memory_space<vmem>>, vector<1x36x256xf32>
    %31 = vector.shape_cast %30 : vector<1x36x256xf32> to vector<36x256xf32>
    %cst_23 = arith.constant dense<0.000000e+00> : vector<8x256xf32>
    %32 = tpu.matmul %29, %31, %cst_23 {dimension_numbers = #tpu.dot_dimension_numbers<[1], [0], [0], [1], [0, 0, 1, 1], [], []>} : vector<8x36xf32>, vector<36x256xf32>, vector<8x256xf32> -> vector<8x256xf32>
    %cst_24 = arith.constant dense<0.000000e+00> : vector<8xf32>
    %33 = vector.multi_reduction <add>, %32, %cst_24 [1] : vector<8x256xf32> to vector<8xf32>
    %34 = vector.shape_cast %33 : vector<8xf32> to vector<8x1xf32>
    %35 = arith.mulf %32, %32 : vector<8x256xf32>
    %cst_25 = arith.constant dense<0.000000e+00> : vector<8xf32>
    %36 = vector.multi_reduction <add>, %35, %cst_25 [1] : vector<8x256xf32> to vector<8xf32>
    %37 = vector.shape_cast %36 : vector<8xf32> to vector<8x1xf32>
    %cst_26 = arith.constant 0.000000e+00 : f32
    %38 = vector.broadcast %cst_26 : f32 to vector<8x1xf32>
    %39 = vector.extract_strided_slice %5 {offsets = [0, 0], sizes = [8, 1], strides = [1, 1]} : vector<8x2xf32> to vector<8x1xf32>
    %40 = arith.mulf %39, %25 : vector<8x1xf32>
    %41 = arith.addf %38, %40 : vector<8x1xf32>
    %42 = vector.extract_strided_slice %19 {offsets = [0, 0], sizes = [8, 1], strides = [1, 1]} : vector<8x2xf32> to vector<8x1xf32>
    %cst_27 = arith.constant 2.560000e+02 : f32
    %43 = vector.broadcast %cst_27 : f32 to vector<8x1xf32>
    %44 = arith.mulf %43, %42 : vector<8x1xf32>
    %45 = arith.addf %41, %44 : vector<8x1xf32>
    %46 = vector.extract_strided_slice %5 {offsets = [0, 1], sizes = [8, 1], strides = [1, 1]} : vector<8x2xf32> to vector<8x1xf32>
    %47 = arith.mulf %46, %34 : vector<8x1xf32>
    %48 = arith.addf %45, %47 : vector<8x1xf32>
    %49 = vector.extract_strided_slice %19 {offsets = [0, 1], sizes = [8, 1], strides = [1, 1]} : vector<8x2xf32> to vector<8x1xf32>
    %cst_28 = arith.constant 2.560000e+02 : f32
    %50 = vector.broadcast %cst_28 : f32 to vector<8x1xf32>
    %51 = arith.mulf %50, %49 : vector<8x1xf32>
    %52 = arith.addf %48, %51 : vector<8x1xf32>
    %cst_29 = arith.constant 0.001953125 : f32
    %53 = vector.broadcast %cst_29 : f32 to vector<8x1xf32>
    %54 = arith.mulf %52, %53 : vector<8x1xf32>
    %cst_30 = arith.constant 0.000000e+00 : f32
    %55 = vector.broadcast %cst_30 : f32 to vector<8x1xf32>
    %56 = vector.extract_strided_slice %5 {offsets = [0, 0], sizes = [8, 1], strides = [1, 1]} : vector<8x2xf32> to vector<8x1xf32>
    %57 = vector.extract_strided_slice %19 {offsets = [0, 0], sizes = [8, 1], strides = [1, 1]} : vector<8x2xf32> to vector<8x1xf32>
    %58 = arith.subf %57, %54 : vector<8x1xf32>
    %59 = arith.mulf %56, %56 : vector<8x1xf32>
    %60 = arith.mulf %59, %28 : vector<8x1xf32>
    %61 = arith.addf %55, %60 : vector<8x1xf32>
    %cst_31 = arith.constant 2.000000e+00 : f32
    %62 = vector.broadcast %cst_31 : f32 to vector<8x1xf32>
    %63 = arith.mulf %62, %56 : vector<8x1xf32>
    %64 = arith.mulf %63, %58 : vector<8x1xf32>
    %65 = arith.mulf %64, %25 : vector<8x1xf32>
    %66 = arith.addf %61, %65 : vector<8x1xf32>
    %cst_32 = arith.constant 2.560000e+02 : f32
    %67 = vector.broadcast %cst_32 : f32 to vector<8x1xf32>
    %68 = arith.mulf %67, %58 : vector<8x1xf32>
    %69 = arith.mulf %68, %58 : vector<8x1xf32>
    %70 = arith.addf %66, %69 : vector<8x1xf32>
    %71 = vector.extract_strided_slice %5 {offsets = [0, 1], sizes = [8, 1], strides = [1, 1]} : vector<8x2xf32> to vector<8x1xf32>
    %72 = vector.extract_strided_slice %19 {offsets = [0, 1], sizes = [8, 1], strides = [1, 1]} : vector<8x2xf32> to vector<8x1xf32>
    %73 = arith.subf %72, %54 : vector<8x1xf32>
    %74 = arith.mulf %71, %71 : vector<8x1xf32>
    %75 = arith.mulf %74, %37 : vector<8x1xf32>
    %76 = arith.addf %70, %75 : vector<8x1xf32>
    %cst_33 = arith.constant 2.000000e+00 : f32
    %77 = vector.broadcast %cst_33 : f32 to vector<8x1xf32>
    %78 = arith.mulf %77, %71 : vector<8x1xf32>
    %79 = arith.mulf %78, %73 : vector<8x1xf32>
    %80 = arith.mulf %79, %34 : vector<8x1xf32>
    %81 = arith.addf %76, %80 : vector<8x1xf32>
    %cst_34 = arith.constant 2.560000e+02 : f32
    %82 = vector.broadcast %cst_34 : f32 to vector<8x1xf32>
    %83 = arith.mulf %82, %73 : vector<8x1xf32>
    %84 = arith.mulf %83, %73 : vector<8x1xf32>
    %85 = arith.addf %81, %84 : vector<8x1xf32>
    %cst_35 = arith.constant 0.001953125 : f32
    %86 = vector.broadcast %cst_35 : f32 to vector<8x1xf32>
    %87 = arith.mulf %85, %86 : vector<8x1xf32>
    %cst_36 = arith.constant 9.99999974E-6 : f32
    %88 = vector.broadcast %cst_36 : f32 to vector<8x1xf32>
    %89 = arith.addf %87, %88 : vector<8x1xf32>
    %90 = math.rsqrt %89 : vector<8x1xf32>
    %91 = arith.mulf %90, %15 : vector<8x1xf32>
    %92 = vector.extract_strided_slice %5 {offsets = [0, 0], sizes = [8, 1], strides = [1, 1]} : vector<8x2xf32> to vector<8x1xf32>
    %93 = arith.mulf %92, %91 : vector<8x1xf32>
    %94 = vector.extract_strided_slice %19 {offsets = [0, 0], sizes = [8, 1], strides = [1, 1]} : vector<8x2xf32> to vector<8x1xf32>
    %95 = arith.subf %94, %54 : vector<8x1xf32>
    %96 = arith.mulf %95, %91 : vector<8x1xf32>
    %97 = arith.addf %96, %16 : vector<8x1xf32>
    %98 = vector.broadcast %93 : vector<8x1xf32> to vector<8x256xf32>
    %99 = arith.mulf %23, %98 : vector<8x256xf32>
    %100 = vector.broadcast %97 : vector<8x1xf32> to vector<8x256xf32>
    %101 = arith.addf %99, %100 : vector<8x256xf32>
    %c0_37 = arith.constant 0 : index
    %c0_38 = arith.constant 0 : index
    %c0_39 = arith.constant 0 : index
    %102 = vector.load %arg5[%c0_37, %c0_38, %c0_39] : memref<2x8x256xf32, #tpu.memory_space<vmem>>, vector<1x8x256xf32>
    %103 = vector.shape_cast %102 : vector<1x8x256xf32> to vector<8x256xf32>
    %104 = vector.shape_cast %101 : vector<8x256xf32> to vector<1x8x256xf32>
    tpu.vector_store %arg5[%c0_37, %c0_38, %c0_39], %104 {strides = array<i32>} : memref<2x8x256xf32, #tpu.memory_space<vmem>>, vector<1x8x256xf32>,
    %105 = vector.extract_strided_slice %5 {offsets = [0, 1], sizes = [8, 1], strides = [1, 1]} : vector<8x2xf32> to vector<8x1xf32>
    %106 = arith.mulf %105, %91 : vector<8x1xf32>
    %107 = vector.extract_strided_slice %19 {offsets = [0, 1], sizes = [8, 1], strides = [1, 1]} : vector<8x2xf32> to vector<8x1xf32>
    %108 = arith.subf %107, %54 : vector<8x1xf32>
    %109 = arith.mulf %108, %91 : vector<8x1xf32>
    %110 = arith.addf %109, %16 : vector<8x1xf32>
    %111 = vector.broadcast %106 : vector<8x1xf32> to vector<8x256xf32>
    %112 = arith.mulf %32, %111 : vector<8x256xf32>
    %113 = vector.broadcast %110 : vector<8x1xf32> to vector<8x256xf32>
    %114 = arith.addf %112, %113 : vector<8x256xf32>
    %c1_40 = arith.constant 1 : index
    %c0_41 = arith.constant 0 : index
    %c0_42 = arith.constant 0 : index
    %115 = vector.load %arg5[%c1_40, %c0_41, %c0_42] : memref<2x8x256xf32, #tpu.memory_space<vmem>>, vector<1x8x256xf32>
    %116 = vector.shape_cast %115 : vector<1x8x256xf32> to vector<8x256xf32>
    %117 = vector.shape_cast %114 : vector<8x256xf32> to vector<1x8x256xf32>
    tpu.vector_store %arg5[%c1_40, %c0_41, %c0_42], %117 {strides = array<i32>} : memref<2x8x256xf32, #tpu.memory_space<vmem>>, vector<1x8x256xf32>,
    return
  }
}

</mosaic_0001>

<bundles_post_ra>
// kernel: tpu_custom_call.1
= control target key start
LH: loop header
LB: loop body
LE: loop exit
PB: predicated region body
PF: predicated region fallthrough
CT: control target
= control target key end

     0   :  { %vm32_vm0 = vcmask 1040384   ;;  %vm141_vm1 = vcmask 1043456   ;;  %vm25_vm2 = vcmask 72704   ;;  %s693_s0 = inlined_call_operand.vmem [shape: f32[2,36,256], index: 0, kind: input, shape index: {}]   ;;  %s694_s1 = inlined_call_operand.vmem [shape: f32[8,36], index: 1, kind: input, shape index: {}]   ;;  %s695_s2 = inlined_call_operand.vmem [shape: f32[9,2], index: 2, kind: input, shape index: {}]   ;;  %s696_s3 = inlined_call_operand.vmem [shape: f32[16,9], index: 3, kind: input, shape index: {}]   ;;  %s697_s4 = inlined_call_operand.vmem [shape: f32[8,3], index: 4, kind: input, shape index: {}]   ;;  %s698_s5 = inlined_call_operand.hbm [shape: f32[2,8,256], index: 5, kind: output, shape index: {}]  }
   0x1   :  { %v24_v0 = vld [vmem:[%s695_s2 + $0x8] sm:$0x1]  ;;  %v135_v2 = vld [vmem:[%s693_s0 + $0x40] sm:$0xf]  ;;  %v134_v4 = vld [vmem:[%s693_s0 + $0x38] sm:$0xff] }
   0x2   :  { %v136_v1 = vld [vmem:[%s693_s0 + $0x48] sm:$0xf]  ;;  %468 = vmatprep.subr.msk.mxu0 %vm32_vm0, %v24_v0  ;;  %v23_v3 = vld [vmem:[%s695_s2] sm:$0xff]  ;;  %v133_v6 = vld [vmem:[%s693_s0 + $0x30] sm:$0xff] }
   0x3   :  { %448 = vmatprep.subr.msk.mxu1 %vm141_vm1, %v136_v1  ;;  %469 = vmatpush3.msk.msra.mxu0 %vm32_vm0, %v24_v0  ;;  %v21_v5 = vld [vmem:[%s696_s3] sm:$0xff]  ;;  %v22_v7 = vld [vmem:[%s696_s3 + $0x8] sm:$0xff]  ;;  %v460_v9 = vld [vmem:[%s693_s0 + $0x98] sm:$0xf] }
   0x4   :  { %449 = vmatpush1.msk.msra.mxu1 %vm141_vm1, %v135_v2  ;;  %470 = vmatprep.subr.mxu0 %v23_v3  ;;  %v132_v8 = vld [vmem:[%s693_s0 + $0x28] sm:$0xff]  ;;  %v131_v10 = vld [vmem:[%s693_s0 + $0x20] sm:$0xff]  ;;  %v459_v11 = vld [vmem:[%s693_s0 + $0x90] sm:$0xf] }
   0x5   :  { %172 = vmatprep.subr.mxu1 %v134_v4  ;;  %471 = vmatpush3.msra.mxu0 %v23_v3  ;;  %v130_v12 = vld [vmem:[%s693_s0 + $0x18] sm:$0xff]  ;;  %v458_v13 = vld [vmem:[%s693_s0 + $0x88] sm:$0xff]  ;;  %v129_v14 = vld [vmem:[%s693_s0 + $0x10] sm:$0xff] }
   0x6   :  { %472 = vmatprep.mubr.msk.f32.mxu0 %vm25_vm2, %v21_v5  ;;  %173 = vmatpush1.msra.mxu1 %v133_v6  ;;  %v457_v15 = vld [vmem:[%s693_s0 + $0x80] sm:$0xff]  ;;  %v128_v16 = vld [vmem:[%s693_s0 + $0x8] sm:$0xff]  ;;  %v456_v17 = vld [vmem:[%s693_s0 + $0x78] sm:$0xff] }
   0x7   :  { %473 = vmatmul.mubr.msk.f32.vlgmr.msra.gmra.mxu0 %vm25_vm2, %v22_v7  ;;  %174 = vmatprep.subr.mxu1 %v132_v8  ;;  %v127_v18 = vld [vmem:[%s693_s0] sm:$0xff] }
   0x8   :  { %461 = vmatprep.subr.msk.mxu0 %vm141_vm1, %v460_v9  ;;  %175 = vmatpush1.msra.mxu1 %v131_v10 }
   0x9   :  { %462 = vmatpush1.msk.msra.mxu0 %vm141_vm1, %v459_v11  ;;  %176 = vmatprep.subr.mxu1 %v130_v12 }
   0xa   :  { %268 = vmatprep.subr.mxu0 %v458_v13 }
   0xb   :  { %10 = vsyncpa [#allocation3], 0  ;;  %177 = vmatpush1.msra.mxu1 %v129_v14  ;;  %269 = vmatpush1.msra.mxu0 %v457_v15  ;;  %v455_v19 = vld [vmem:[%s693_s0 + $0x70] sm:$0xff]  ;;  %v126_v20 = vld [vmem:[%s694_s1] sm:$0xff]  ;;  %vm137_vm3 = vcmask 293888   ;;  %v517_v22 = vmov 0.0  }
   0xc   :  { %178 = vmatprep.subr.mxu1 %v128_v16  ;;  %270 = vmatprep.subr.mxu0 %v456_v17  ;;  %v454_v21 = vld [vmem:[%s693_s0 + $0x68] sm:$0xff]  ;;  %v453_v23 = vld [vmem:[%s693_s0 + $0x60] sm:$0xff]  ;;  %v452_v24 = vld [vmem:[%s693_s0 + $0x58] sm:$0xff]  ;;  %v518_v26 = vmov 0   ;;  %s519_s15 = smov 127   ;;  %s522_s3 = smov 126  }
   0xd   :  { %179 = vmatpush1.msra.mxu1 %v127_v18  ;;  %212 = vmatprep.mubr.f32.mxu1 %v517_v22  ;;  %v451_v25 = vld [vmem:[%s693_s0 + $0x50] sm:$0xff]  ;;  %v654_v35 = vld [vmem:[%s697_s4] sm:$0xff]  ;;  %s520_s4 = smov 1   ;;  %s523_s16 = smov [#allocation2]  }
   0xe   :  { %271 = vmatpush1.msra.mxu0 %v455_v19  ;;  %450 = vmatmul.mubr.msk.f32.vlgmr.msra.gmra.mxu1 %vm137_vm3, %v126_v20  ;;  %s433_s17 = sshll.u32 %s523_s16, 4  ;;  %s434_s17 = int_to_ptr.vmem [resolvable:$true] %s433_s17 }
   0xf   :  { %272 = vmatprep.subr.mxu0 %v454_v21  ;;  %308 = vmatprep.mubr.f32.mxu0 %v517_v22  ;;  %s495_s18 = scalar_lea.vmem %s434_s17, 512  ;;  %p500_p1 = scmp.lt.s32.totalorder %s434_s17, %s434_s17 }
  0x10   :  { %273 = vmatpush1.msra.mxu0 %v453_v23  ;;  %484 = vset.pattern.permute.xlu0 %v518_v26  ;;  %p496_p0 = scmp.ne.s32.totalorder %s434_s17, %s495_s18  ;;  %p501_p2 = scmp.lt.s32.totalorder %s495_s18, %s495_s18 }
  0x11   :  { %274 = vmatprep.subr.mxu0 %v452_v24  ;;  %485 = vset.pattern.permute.xlu1 %v518_v26 }
  0x12   :  { %275 = vmatpush1.msra.mxu0 %v451_v25  ;;  %v521_v25 = vmov 1   ;;  %p502_p3 = por %p501_p2, %p500_p1 }
  0x13   :  { %463 = vmatmul.mubr.msk.f32.vlgmr.msra.gmra.mxu0 %vm137_vm3, %v126_v20 }
  0x14   :  { %p503_p4 = pnand %p502_p3, %p496_p0 }
  0xc7   :  { %v474_v27 = vpop.f32.mrf.mxu0 }
  0xc8   :  { %v113_v36 = vmin.f32 %v474_v27, 0.0  ;;  %vm112_vm4 = vcmp.gt.f32.partialorder %v474_v27, 0.0 }
  0xc9   :  { %v102_v30 = vpop.f32.mrf.mxu0 }
  0xca   :  { %v114_v37 = vmul.f32 1.442695, %v113_v36  ;;  %489 = vtanh.f32 %v102_v30 }
  0xcc   :  { %491 = vpow2.f32 %v114_v37 }
  0xce   :  { %v639_v28 = vpop.f32.mrf.mxu1 }
  0xcf   :  { %v222_v60 = vmul.f32 %v639_v28, %v639_v28 }
  0xd0   :  { %v641_v29 = vpop.f32.mrf.mxu1 }
  0xd1   :  { %v219_v31 = vadd.f32 %v641_v29, %v639_v28  ;;  %v223_v59 = vmul.f32 %v641_v29, %v641_v29 }
  0xd3   :  { %v645_v32 = vpop.f32.mrf.mxu0  ;;  %220 = vadd.xlane.f32.xlu1 %v219_v31  ;;  %v224_v61 = vadd.f32 %v223_v59, %v222_v60 }
  0xd4   :  { %v318_v49 = vmul.f32 %v645_v32, %v645_v32 }
  0xd5   :  { %v647_v33 = vpop.f32.mrf.mxu0 }
  0xd6   :  { %v315_v34 = vadd.f32 %v647_v33, %v645_v32  ;;  %v319_v48 = vmul.f32 %v647_v33, %v647_v33 }
  0xd7   :  { %v657_v38 = vpop.eup %489 }
  0xd8   :  { %316 = vadd.xlane.f32.xlu0 %v315_v34  ;;  %v320_v50 = vadd.f32 %v319_v48, %v318_v49  ;;  %v340_v62 = vmul.f32 %v657_v38, %v657_v38  ;;  %v343_v3 = vmul.f32 2.0, %v657_v38 }
  0xd9   :  { %v492_v41 = vpop.eup %491 }
  0xda   :  { %v447_v42 = vadd.f32 -1.0, %v492_v41 }
  0xdc   :  { %v117_v45 = vsel %vm112_vm4, %v474_v27, %v447_v42 }
  0xee   :  { %121 = vperm.xlu0 %484, %v654_v35  }
  0xf2   :  { %488 = vset.pattern.permute.xlu0 %v521_v25 }
 0x15c   :  { %v221_v51 = vpop.xlane.xlu1 %220 }
 0x15d   :  { %v323_v52 = vmul.f32 %v657_v38, %v221_v51 }
 0x161   :  { %v317_v39 = vpop.xlane.xlu0 %316 }
 0x162   :  { %v327_v40 = vmul.f32 %v657_v38, %v317_v39 }
 0x164   :  { %329 = vrot.lane.b32.xlu1 %v327_v40, %s519_s15 }
 0x169   :  { %v122_v43 = vpop.permute.xlu0 %121 }
 0x16a   :  { %v124_v44 = vmul.f32 %v657_v38, %v122_v43 }
 0x16c   :  { %v125_v46 = vadd.f32 %v124_v44, %v117_v45 }
 0x16e   :  { %v325_v47 = vmul.f32 256.0, %v125_v46 }
 0x170   :  { %334 = vrot.lane.b32.xlu1 %v325_v47, %s519_s15  ;;  %v326_v54 = vadd.f32 %v325_v47, %v323_v52 }
 0x194   :  { %321 = vadd.xlane.f32.xlu1 %v320_v50 }
 0x1d6   :  { %v330_v53 = vpop.permute.xlu1 %329 }
 0x1d7   :  { %v332_v55 = vadd.f32 %v330_v53, %v326_v54 }
 0x1e2   :  { %v335_v56 = vpop.permute.xlu1 %334 }
 0x1e3   :  { %v337_v57 = vadd.f32 %v335_v56, %v332_v55 }
 0x1e5   :  { %v338_v58 = vmul.f32 0.001953125, %v337_v57 }
 0x1e7   :  { %351 = vrot.lane.b32.xlu0 %v338_v58, %s520_s4  ;;  %v339_v8 = vsub.f32 %v125_v46, %v338_v58 }
 0x1e9   :  { %v344_v10 = vmul.f32 %v343_v3, %v339_v8  ;;  %v347_v13 = vmul.f32 256.0, %v339_v8 }
 0x1eb   :  { %v345_v12 = vmul.f32 %v344_v10, %v221_v51  ;;  %v348_v15 = vmul.f32 %v347_v13, %v339_v8 }
 0x206   :  { %225 = vadd.xlane.f32.xlu0 %v224_v61 }
 0x21c   :  { %378 = vrot.lane.b32.xlu0 %v654_v35, %s519_s15 }
 0x21d   :  { %v322_v63 = vpop.xlane.xlu1 %321 }
 0x21e   :  { %v355_v0 = vmul.f32 %v340_v62, %v322_v63 }
 0x220   :  { %357 = vrot.lane.b32.xlu1 %v355_v0, %s519_s15 }
 0x259   :  { %v352_v1 = vpop.permute.xlu0 %351 }
 0x25a   :  { %v354_v2 = vsub.f32 %v125_v46, %v352_v1 }
 0x25c   :  { %v361_v4 = vmul.f32 %v354_v2, %v343_v3  ;;  %v368_v6 = vmul.f32 256.0, %v354_v2 }
 0x25e   :  { %v362_v5 = vmul.f32 %v361_v4, %v317_v39  ;;  %v369_v7 = vmul.f32 %v368_v6, %v354_v2 }
 0x260   :  { %364 = vrot.lane.b32.xlu1 %v362_v5, %s519_s15 }
 0x264   :  { %371 = vrot.lane.b32.xlu1 %v369_v7, %s519_s15 }
 0x28f   :  { %v226_v9 = vpop.xlane.xlu0 %225 }
 0x290   :  { %v341_v11 = vmul.f32 %v340_v62, %v226_v9 }
 0x292   :  { %v346_v14 = vadd.f32 %v345_v12, %v341_v11  ;;  %v358_v16 = vpop.permute.xlu1 %357 }
 0x293   :  { %v379_v27 = vpop.permute.xlu0 %378 }
 0x294   :  { %v349_v17 = vadd.f32 %v348_v15, %v346_v14 }
 0x296   :  { %v360_v19 = vadd.f32 %v358_v16, %v349_v17 }
 0x2d2   :  { %v365_v18 = vpop.permute.xlu1 %364 }
 0x2d3   :  { %v367_v20 = vadd.f32 %v365_v18, %v360_v19 }
 0x2d6   :  { %v372_v21 = vpop.permute.xlu1 %371 }
 0x2d7   :  { %v374_v22 = vadd.f32 %v372_v21, %v367_v20 }
 0x2d9   :  { %v375_v23 = vmul.f32 0.001953125, %v374_v22 }
 0x2db   :  { %v376_v24 = vadd.f32 1e-05, %v375_v23 }
 0x2dd   :  { %493 = vrsqrt.f32 %v376_v24 }
 0x2ea   :  { %v494_v30 = vpop.eup %493 }
 0x2eb   :  { %v381_v31 = vmul.f32 %v494_v30, %v379_v27 }
 0x2ed   :  { %405 = vrot.lane.b32.xlu1 %v381_v31, %s520_s4  ;;  %v382_v34 = vmul.f32 %v657_v38, %v381_v31  ;;  %v383_v41 = vmul.f32 %v381_v31, %v339_v8 }
 0x2f1   :  { %384 = vrot.lane.b32.xlu1 %v654_v35, %s522_s3 }
 0x2f5   :  { %390 = vperm.xlu1 %485, %v382_v34  }
 0x2f9   :  { %486 = vset.pattern.permute.xlu1 %v521_v25 }
 0x35f   :  { %v406_v36 = vpop.permute.xlu1 %405 }
 0x360   :  { %v408_v37 = vmul.f32 %v657_v38, %v406_v36  ;;  %v409_v39 = vmul.f32 %v406_v36, %v354_v2 }
 0x362   :  { %v410_v40 = vadd.f32 %v409_v39, %v379_v27  ;;  %413 = vperm.xlu1 %486, %v408_v37  }
 0x363   :  { %v385_v42 = vpop.permute.xlu1 %384 }
 0x364   :  { %v387_v43 = vadd.f32 %v385_v42, %v383_v41  ;;  %420 = vperm.xlu0 %488, %v410_v40  }
 0x366   :  { %487 = vset.pattern.permute.xlu1 %v518_v26 }
 0x367   :  { %397 = vperm.xlu1 %487, %v387_v43  }
 0x370   :  { %v391_v44 = vpop.permute.xlu1 %390 }
 0x371   :  { %v393_v49 = vmul.f32 %v391_v44, %v639_v28  ;;  %v394_v50 = vmul.f32 %v391_v44, %v641_v29 }
 0x3dd   :  { %v414_v45 = vpop.permute.xlu1 %413 }
 0x3de   :  { %v416_v35 = vmul.f32 %v414_v45, %v645_v32  ;;  %v417_v46 = vmul.f32 %v414_v45, %v647_v33 }
 0x3df   :  { %v421_v47 = vpop.permute.xlu0 %420 }
 0x3e0   :  { %v423_v38 = vadd.f32 %v421_v47, %v416_v35  ;;  %v424_v48 = vadd.f32 %v421_v47, %v417_v46 }
 0x3e2   :  { %426 = vst [vmem:[#allocation2 + $0x10] sm:$0xff] %v423_v38  ;;  %427 = vst [vmem:[#allocation2 + $0x18] sm:$0xff] %v424_v48  ;;  %v398_v51 = vpop.permute.xlu1 %397 }
 0x3e3   :  { %v400_v26 = vadd.f32 %v398_v51, %v393_v49  ;;  %v401_v52 = vadd.f32 %v398_v51, %v394_v50 }
 0x3e5   :  { %402 = vst [vmem:[#allocation2] sm:$0xff] %v400_v26  ;;  %403 = vst [vmem:[#allocation2 + $0x8] sm:$0xff] %v401_v52 }
 0x3e6   :  { %506 = shalt.err (!%p503_p4)
}
 0x3e7   :  { %s524_s19 = smov 256   ;;  %s525_s20 = smov 16  }
 0x3e8   :  { %439 = dma.vmem_to_hbm [thread:$0]  %s434_s17, 512, %s698_s5, [#allocation3], %s524_s19, %s524_s19, %s525_s20  }
 0x3e9   :  { %515 = dma.done.wait [#allocation3], 512  }
 0x3ea   :  { %516 = vsyncadd [#allocation3], 4294966784 }
 0x3eb   :  { %443 = vsyncpa [#allocation3], 1 }

</bundles_post_ra>
